<compile_context>
chip_gen: v7x
topology: tpu7x:2x2x1
jax: 0.10.0
libtpu: 0.0.40
codegen_flags: <defaults>
</compile_context>

<pallas_src>
import jax
import jax.numpy as jnp
import numpy as np
from jax.experimental import pallas as pl
from jax.experimental.pallas import tpu as pltpu


def feature_fusion_concat(dgcnn_feat, geo_feat, w, b, bn_gamma, bn_beta,
                          eps=1e-5, tn_max=4096):
    """dgcnn_feat: (B, C1, N), geo_feat: (B, C2, N) -> (B, O, N) float32."""
    B, C1, N = dgcnn_feat.shape
    _, C2, _ = geo_feat.shape
    O, Cin = w.shape
    assert Cin == C1 + C2
    # Training-mode BN subtracts mean(Wx + b) over (B, N), so the conv bias
    # cancels exactly; safe to drop for this (training-statistics) forward.
    del b
    M = B * N

    # ---- Point-tile size: as large as possible, lane-dense when tiled. ----
    if N <= tn_max:
        TN = N                       # single tile along N (full-dim block OK)
    else:
        TN = max(128, (tn_max // 128) * 128)   # multiple of 128
    nN = pl.cdiv(N, TN)
    ragged = (N % TN) != 0

    vmem_params_seq = pltpu.CompilerParams(
        dimension_semantics=("arbitrary", "arbitrary"),
        vmem_limit_bytes=32 * 1024 * 1024,
    )
    vmem_params_par = pltpu.CompilerParams(
        dimension_semantics=("parallel", "parallel"),
        vmem_limit_bytes=32 * 1024 * 1024,
    )

    x1_spec = pl.BlockSpec((1, C1, TN), lambda bi, ni: (bi, 0, ni))
    x2_spec = pl.BlockSpec((1, C2, TN), lambda bi, ni: (bi, 0, ni))

    # ---------------- Pass 1: X-moment statistics (in-kernel accumulation). --
    def stats_kernel(x1_ref, x2_ref, s1_ref, s2_ref, s11_ref, s12_ref, s22_ref):
        @pl.when((pl.program_id(0) == 0) & (pl.program_id(1) == 0))
        def _():
            s1_ref[...] = jnp.zeros_like(s1_ref)
            s2_ref[...] = jnp.zeros_like(s2_ref)
            s11_ref[...] = jnp.zeros_like(s11_ref)
            s12_ref[...] = jnp.zeros_like(s12_ref)
            s22_ref[...] = jnp.zeros_like(s22_ref)

        x1 = x1_ref[0]                                   # (C1, TN)
        x2 = x2_ref[0]                                   # (C2, TN)
        if ragged:                                       # mask tail tile lanes
            ni = pl.program_id(1)
            col = jax.lax.broadcasted_iota(jnp.int32, (1, TN), 1) + ni * TN
            valid = col < N
            x1 = jnp.where(valid, x1, 0.0)
            x2 = jnp.where(valid, x2, 0.0)

        dn = (((1,), (1,)), ((), ()))                    # contract point axis
        s1_ref[...] += jnp.sum(x1, axis=-1, keepdims=True)
        s2_ref[...] += jnp.sum(x2, axis=-1, keepdims=True)
        s11_ref[...] += jax.lax.dot_general(
            x1, x1, dn, preferred_element_type=jnp.float32)
        s12_ref[...] += jax.lax.dot_general(
            x1, x2, dn, preferred_element_type=jnp.float32)
        s22_ref[...] += jax.lax.dot_general(
            x2, x2, dn, preferred_element_type=jnp.float32)

    def const_spec(shape):
        return pl.BlockSpec(shape, lambda bi, ni: (0, 0))

    s1, s2, s11, s12, s22 = pl.pallas_call(
        stats_kernel,
        out_shape=(
            jax.ShapeDtypeStruct((C1, 1), jnp.float32),
            jax.ShapeDtypeStruct((C2, 1), jnp.float32),
            jax.ShapeDtypeStruct((C1, C1), jnp.float32),
            jax.ShapeDtypeStruct((C1, C2), jnp.float32),
            jax.ShapeDtypeStruct((C2, C2), jnp.float32),
        ),
        grid=(B, nN),
        in_specs=[x1_spec, x2_spec],
        out_specs=[const_spec((C1, 1)), const_spec((C2, 1)),
                   const_spec((C1, C1)), const_spec((C1, C2)),
                   const_spec((C2, C2))],
        compiler_params=vmem_params_seq,
        cost_estimate=pl.CostEstimate(
            flops=2 * M * (C1 * C1 + C1 * C2 + C2 * C2) + M * Cin,
            transcendentals=0,
            bytes_accessed=4 * (M * Cin + C1 + C2 + C1 * C1 + C1 * C2 + C2 * C2),
        ),
    )(dgcnn_feat, geo_feat)

    # ---- Tiny fold (O(Cin^2 * O) flops): BN scale/shift from X-moments, ----
    # ---- scale folded into the conv weights so pass 2 is dot+shift+relu. ----
    w1 = w[:, :C1]                                   # (O, C1)
    w2 = w[:, C1:]                                   # (O, C2)
    mean1 = s1 / M                                   # (C1, 1)
    mean2 = s2 / M                                   # (C2, 1)
    mean_y = w1 @ mean1 + w2 @ mean2                 # (O, 1)
    ey2 = (jnp.sum((w1 @ s11) * w1, axis=-1, keepdims=True)
           + 2.0 * jnp.sum((w1 @ s12) * w2, axis=-1, keepdims=True)
           + jnp.sum((w2 @ s22) * w2, axis=-1, keepdims=True)) / M
    var = jnp.maximum(ey2 - mean_y * mean_y, 0.0)    # (O, 1)
    scale = bn_gamma.reshape(O, 1) * jax.lax.rsqrt(var + eps)
    shift = bn_beta.reshape(O, 1) - mean_y * scale
    w1s = scale * w1                                 # (O, C1) scaled weights
    w2s = scale * w2                                 # (O, C2)

    # ---------------- Pass 2: y = W_s @ X + shift, ReLU, lane-dense store. ---
    def norm_kernel(x1_ref, x2_ref, w1_ref, w2_ref, shift_ref, o_ref):
        y = (jnp.dot(w1_ref[...], x1_ref[0], preferred_element_type=jnp.float32)
             + jnp.dot(w2_ref[...], x2_ref[0],
                       preferred_element_type=jnp.float32))
        o_ref[0] = jnp.maximum(y + shift_ref[...], 0.0).astype(o_ref.dtype)

    out = pl.pallas_call(
        norm_kernel,
        out_shape=jax.ShapeDtypeStruct((B, O, N), jnp.float32),
        grid=(B, nN),
        in_specs=[x1_spec, x2_spec,
                  pl.BlockSpec((O, C1), lambda bi, ni: (0, 0)),
                  pl.BlockSpec((O, C2), lambda bi, ni: (0, 0)),
                  pl.BlockSpec((O, 1), lambda bi, ni: (0, 0))],
        out_specs=pl.BlockSpec((1, O, TN), lambda bi, ni: (bi, 0, ni)),
        compiler_params=vmem_params_par,
        cost_estimate=pl.CostEstimate(
            flops=2 * M * Cin * O,
            transcendentals=0,
            bytes_accessed=4 * (M * Cin + M * O + O * Cin + O),
        ),
    )(dgcnn_feat, geo_feat, w1s, w2s, shift)

    return out


def _reference(dgcnn_feat, geo_feat, w, b, bn_gamma, bn_beta):
    """Pure-JAX reference of the PyTorch forward (concat path, training BN)."""
    fused = jnp.concatenate([dgcnn_feat, geo_feat], axis=1)        # (B, Cin, N)
    y = jnp.einsum("oc,bcn->bon", w, fused) + b[None, :, None]     # (B, O, N)
    mean = jnp.mean(y, axis=(0, 2), keepdims=True)
    var = jnp.mean((y - mean) ** 2, axis=(0, 2), keepdims=True)
    y_norm = (y - mean) * jax.lax.rsqrt(var + 1e-5)
    out = bn_gamma[None, :, None] * y_norm + bn_beta[None, :, None]
    return jnp.maximum(out, 0.0)


if __name__ == "__main__":
    # Small shapes consistent with the module.
    B, N = 2, 256
    dgcnn_dim, geo_dim, output_dim = 4, 4, 32
    Cin = dgcnn_dim + geo_dim

    key = jax.random.PRNGKey(0)
    k1, k2, k3, k4 = jax.random.split(key, 4)

    dgcnn_feat = jax.random.normal(k1, (B, dgcnn_dim, N), dtype=jnp.float32)
    geo_feat = jax.random.normal(k2, (B, geo_dim, N), dtype=jnp.float32)

    # Deterministic parameter init (shapes from nn.Conv1d / nn.BatchNorm1d).
    bound = 1.0 / np.sqrt(Cin)
    w = jax.random.uniform(k3, (output_dim, Cin), jnp.float32, -bound, bound)
    b = jax.random.uniform(k4, (output_dim,), jnp.float32, -bound, bound)
    bn_gamma = jnp.ones((output_dim,), jnp.float32)   # BatchNorm1d defaults
    bn_beta = jnp.zeros((output_dim,), jnp.float32)

    ref = _reference(dgcnn_feat, geo_feat, w, b, bn_gamma, bn_beta)

    # Default path: single big point tile per batch (TN = N).
    out = feature_fusion_concat(dgcnn_feat, geo_feat, w, b, bn_gamma, bn_beta)
    out = jax.block_until_ready(out)
    np.testing.assert_allclose(np.asarray(out), np.asarray(ref),
                               rtol=1e-4, atol=1e-4)
    assert out.shape == (B, output_dim, N)

    # Multi-tile path: force TN=128 so the in-kernel statistics accumulator is
    # exercised across a (B, nN) = (2, 2) grid.
    out_tiled = feature_fusion_concat(dgcnn_feat, geo_feat, w, b,
                                      bn_gamma, bn_beta, tn_max=128)
    out_tiled = jax.block_until_ready(out_tiled)
    np.testing.assert_allclose(np.asarray(out_tiled), np.asarray(ref),
                               rtol=1e-4, atol=1e-4)

    print("KERNEL_OK")
</pallas_src>

<mosaic_0001>
module attributes {stable_mosaic.version = 11 : i64} {
  func.func @stats_kernel(%arg0: i32, %arg1: i32, %arg2: memref<1x4x256xf32, #tpu.memory_space<vmem>>, %arg3: memref<1x4x256xf32, #tpu.memory_space<vmem>>, %arg4: memref<4x1xf32, #tpu.memory_space<vmem>>, %arg5: memref<4x1xf32, #tpu.memory_space<vmem>>, %arg6: memref<4x4xf32, #tpu.memory_space<vmem>>, %arg7: memref<4x4xf32, #tpu.memory_space<vmem>>, %arg8: memref<4x4xf32, #tpu.memory_space<vmem>>) attributes {dimension_semantics = [#tpu.dimension_semantics<arbitrary>, #tpu.dimension_semantics<arbitrary>], iteration_bounds = array<i64: 2, 1>, scalar_prefetch = 0 : i64, scratch_operands = 0 : i64, tpu.core_type = #tpu.core_type<tc>, window_params = [{transform_indices = @transform_0, window_bounds = array<i64: 1, 4, 256>}, {transform_indices = @transform_1, window_bounds = array<i64: 1, 4, 256>}, {pipeline_mode = #tpu.pipeline_mode<synchronous>, transform_indices = @transform_2, window_bounds = array<i64: 4, 1>}, {pipeline_mode = #tpu.pipeline_mode<synchronous>, transform_indices = @transform_3, window_bounds = array<i64: 4, 1>}, {pipeline_mode = #tpu.pipeline_mode<synchronous>, transform_indices = @transform_4, window_bounds = array<i64: 4, 4>}, {pipeline_mode = #tpu.pipeline_mode<synchronous>, transform_indices = @transform_5, window_bounds = array<i64: 4, 4>}, {pipeline_mode = #tpu.pipeline_mode<synchronous>, transform_indices = @transform_6, window_bounds = array<i64: 4, 4>}]} {
    %c0_i32 = arith.constant 0 : i32
    %0 = arith.cmpi eq, %arg0, %c0_i32 : i32
    %c0_i32_0 = arith.constant 0 : i32
    %1 = arith.cmpi eq, %arg1, %c0_i32_0 : i32
    %2 = arith.andi %0, %1 : i1
    %3 = arith.extui %2 : i1 to i32
    %c0_i32_1 = arith.constant 0 : i32
    %4 = arith.cmpi ne, %3, %c0_i32_1 : i32
    scf.if %4 {
      %cst_31 = arith.constant 0.000000e+00 : f32
      %31 = vector.broadcast %cst_31 : f32 to vector<4x1xf32>
      %c0_32 = arith.constant 0 : index
      %c0_33 = arith.constant 0 : index
      %32 = vector.load %arg4[%c0_32, %c0_33] : memref<4x1xf32, #tpu.memory_space<vmem>>, vector<4x1xf32>
      tpu.vector_store %arg4[%c0_32, %c0_33], %31 {strides = array<i32>} : memref<4x1xf32, #tpu.memory_space<vmem>>, vector<4x1xf32>,
      %cst_34 = arith.constant 0.000000e+00 : f32
      %33 = vector.broadcast %cst_34 : f32 to vector<4x1xf32>
      %c0_35 = arith.constant 0 : index
      %c0_36 = arith.constant 0 : index
      %34 = vector.load %arg5[%c0_35, %c0_36] : memref<4x1xf32, #tpu.memory_space<vmem>>, vector<4x1xf32>
      tpu.vector_store %arg5[%c0_35, %c0_36], %33 {strides = array<i32>} : memref<4x1xf32, #tpu.memory_space<vmem>>, vector<4x1xf32>,
      %cst_37 = arith.constant 0.000000e+00 : f32
      %35 = vector.broadcast %cst_37 : f32 to vector<4x4xf32>
      %c0_38 = arith.constant 0 : index
      %c0_39 = arith.constant 0 : index
      %36 = vector.load %arg6[%c0_38, %c0_39] : memref<4x4xf32, #tpu.memory_space<vmem>>, vector<4x4xf32>
      tpu.vector_store %arg6[%c0_38, %c0_39], %35 {strides = array<i32>} : memref<4x4xf32, #tpu.memory_space<vmem>>, vector<4x4xf32>,
      %cst_40 = arith.constant 0.000000e+00 : f32
      %37 = vector.broadcast %cst_40 : f32 to vector<4x4xf32>
      %c0_41 = arith.constant 0 : index
      %c0_42 = arith.constant 0 : index
      %38 = vector.load %arg7[%c0_41, %c0_42] : memref<4x4xf32, #tpu.memory_space<vmem>>, vector<4x4xf32>
      tpu.vector_store %arg7[%c0_41, %c0_42], %37 {strides = array<i32>} : memref<4x4xf32, #tpu.memory_space<vmem>>, vector<4x4xf32>,
      %cst_43 = arith.constant 0.000000e+00 : f32
      %39 = vector.broadcast %cst_43 : f32 to vector<4x4xf32>
      %c0_44 = arith.constant 0 : index
      %c0_45 = arith.constant 0 : index
      %40 = vector.load %arg8[%c0_44, %c0_45] : memref<4x4xf32, #tpu.memory_space<vmem>>, vector<4x4xf32>
      tpu.vector_store %arg8[%c0_44, %c0_45], %39 {strides = array<i32>} : memref<4x4xf32, #tpu.memory_space<vmem>>, vector<4x4xf32>,
    } else {
    }
    %c0 = arith.constant 0 : index
    %c0_2 = arith.constant 0 : index
    %c0_3 = arith.constant 0 : index
    %5 = vector.load %arg2[%c0, %c0_2, %c0_3] : memref<1x4x256xf32, #tpu.memory_space<vmem>>, vector<1x4x256xf32>
    %6 = vector.shape_cast %5 : vector<1x4x256xf32> to vector<4x256xf32>
    %c0_4 = arith.constant 0 : index
    %c0_5 = arith.constant 0 : index
    %c0_6 = arith.constant 0 : index
    %7 = vector.load %arg3[%c0_4, %c0_5, %c0_6] : memref<1x4x256xf32, #tpu.memory_space<vmem>>, vector<1x4x256xf32>
    %8 = vector.shape_cast %7 : vector<1x4x256xf32> to vector<4x256xf32>
    %c0_7 = arith.constant 0 : index
    %c0_8 = arith.constant 0 : index
    %9 = vector.load %arg4[%c0_7, %c0_8] : memref<4x1xf32, #tpu.memory_space<vmem>>, vector<4x1xf32>
    %cst = arith.constant dense<0.000000e+00> : vector<4xf32>
    %10 = vector.multi_reduction <add>, %6, %cst [1] : vector<4x256xf32> to vector<4xf32>
    %11 = vector.shape_cast %10 : vector<4xf32> to vector<4x1xf32>
    %12 = arith.addf %9, %11 : vector<4x1xf32>
    %c0_9 = arith.constant 0 : index
    %c0_10 = arith.constant 0 : index
    %13 = vector.load %arg4[%c0_9, %c0_10] : memref<4x1xf32, #tpu.memory_space<vmem>>, vector<4x1xf32>
    tpu.vector_store %arg4[%c0_9, %c0_10], %12 {strides = array<i32>} : memref<4x1xf32, #tpu.memory_space<vmem>>, vector<4x1xf32>,
    %c0_11 = arith.constant 0 : index
    %c0_12 = arith.constant 0 : index
    %14 = vector.load %arg5[%c0_11, %c0_12] : memref<4x1xf32, #tpu.memory_space<vmem>>, vector<4x1xf32>
    %cst_13 = arith.constant dense<0.000000e+00> : vector<4xf32>
    %15 = vector.multi_reduction <add>, %8, %cst_13 [1] : vector<4x256xf32> to vector<4xf32>
    %16 = vector.shape_cast %15 : vector<4xf32> to vector<4x1xf32>
    %17 = arith.addf %14, %16 : vector<4x1xf32>
    %c0_14 = arith.constant 0 : index
    %c0_15 = arith.constant 0 : index
    %18 = vector.load %arg5[%c0_14, %c0_15] : memref<4x1xf32, #tpu.memory_space<vmem>>, vector<4x1xf32>
    tpu.vector_store %arg5[%c0_14, %c0_15], %17 {strides = array<i32>} : memref<4x1xf32, #tpu.memory_space<vmem>>, vector<4x1xf32>,
    %c0_16 = arith.constant 0 : index
    %c0_17 = arith.constant 0 : index
    %19 = vector.load %arg6[%c0_16, %c0_17] : memref<4x4xf32, #tpu.memory_space<vmem>>, vector<4x4xf32>
    %cst_18 = arith.constant dense<0.000000e+00> : vector<4x4xf32>
    %20 = tpu.matmul %6, %6, %cst_18 {dimension_numbers = #tpu.dot_dimension_numbers<[1], [1], [0], [0], [0, 0, 1, 0], [], []>} : vector<4x256xf32>, vector<4x256xf32>, vector<4x4xf32> -> vector<4x4xf32>
    %21 = arith.addf %19, %20 : vector<4x4xf32>
    %c0_19 = arith.constant 0 : index
    %c0_20 = arith.constant 0 : index
    %22 = vector.load %arg6[%c0_19, %c0_20] : memref<4x4xf32, #tpu.memory_space<vmem>>, vector<4x4xf32>
    tpu.vector_store %arg6[%c0_19, %c0_20], %21 {strides = array<i32>} : memref<4x4xf32, #tpu.memory_space<vmem>>, vector<4x4xf32>,
    %c0_21 = arith.constant 0 : index
    %c0_22 = arith.constant 0 : index
    %23 = vector.load %arg7[%c0_21, %c0_22] : memref<4x4xf32, #tpu.memory_space<vmem>>, vector<4x4xf32>
    %cst_23 = arith.constant dense<0.000000e+00> : vector<4x4xf32>
    %24 = tpu.matmul %6, %8, %cst_23 {dimension_numbers = #tpu.dot_dimension_numbers<[1], [1], [0], [0], [0, 0, 1, 0], [], []>} : vector<4x256xf32>, vector<4x256xf32>, vector<4x4xf32> -> vector<4x4xf32>
    %25 = arith.addf %23, %24 : vector<4x4xf32>
    %c0_24 = arith.constant 0 : index
    %c0_25 = arith.constant 0 : index
    %26 = vector.load %arg7[%c0_24, %c0_25] : memref<4x4xf32, #tpu.memory_space<vmem>>, vector<4x4xf32>
    tpu.vector_store %arg7[%c0_24, %c0_25], %25 {strides = array<i32>} : memref<4x4xf32, #tpu.memory_space<vmem>>, vector<4x4xf32>,
    %c0_26 = arith.constant 0 : index
    %c0_27 = arith.constant 0 : index
    %27 = vector.load %arg8[%c0_26, %c0_27] : memref<4x4xf32, #tpu.memory_space<vmem>>, vector<4x4xf32>
    %cst_28 = arith.constant dense<0.000000e+00> : vector<4x4xf32>
    %28 = tpu.matmul %8, %8, %cst_28 {dimension_numbers = #tpu.dot_dimension_numbers<[1], [1], [0], [0], [0, 0, 1, 0], [], []>} : vector<4x256xf32>, vector<4x256xf32>, vector<4x4xf32> -> vector<4x4xf32>
    %29 = arith.addf %27, %28 : vector<4x4xf32>
    %c0_29 = arith.constant 0 : index
    %c0_30 = arith.constant 0 : index
    %30 = vector.load %arg8[%c0_29, %c0_30] : memref<4x4xf32, #tpu.memory_space<vmem>>, vector<4x4xf32>
    tpu.vector_store %arg8[%c0_29, %c0_30], %29 {strides = array<i32>} : memref<4x4xf32, #tpu.memory_space<vmem>>, vector<4x4xf32>,
    return
  }
  func.func @transform_0(%arg0: i32, %arg1: i32) -> (i32, i32, i32) {
    %c0_i32 = arith.constant 0 : i32
    %c0_i32_0 = arith.constant 0 : i32
    return %arg0, %c0_i32, %arg1 : i32, i32, i32
  }
  func.func @transform_1(%arg0: i32, %arg1: i32) -> (i32, i32, i32) {
    %c0_i32 = arith.constant 0 : i32
    %c0_i32_0 = arith.constant 0 : i32
    return %arg0, %c0_i32, %arg1 : i32, i32, i32
  }
  func.func @transform_2(%arg0: i32, %arg1: i32) -> (i32, i32) {
    %c0_i32 = arith.constant 0 : i32
    %c0_i32_0 = arith.constant 0 : i32
    %c0_i32_1 = arith.constant 0 : i32
    return %c0_i32, %c0_i32_0 : i32, i32
  }
  func.func @transform_3(%arg0: i32, %arg1: i32) -> (i32, i32) {
    %c0_i32 = arith.constant 0 : i32
    %c0_i32_0 = arith.constant 0 : i32
    %c0_i32_1 = arith.constant 0 : i32
    return %c0_i32, %c0_i32_0 : i32, i32
  }
  func.func @transform_4(%arg0: i32, %arg1: i32) -> (i32, i32) {
    %c0_i32 = arith.constant 0 : i32
    %c0_i32_0 = arith.constant 0 : i32
    %c0_i32_1 = arith.constant 0 : i32
    return %c0_i32, %c0_i32_0 : i32, i32
  }
  func.func @transform_5(%arg0: i32, %arg1: i32) -> (i32, i32) {
    %c0_i32 = arith.constant 0 : i32
    %c0_i32_0 = arith.constant 0 : i32
    %c0_i32_1 = arith.constant 0 : i32
    return %c0_i32, %c0_i32_0 : i32, i32
  }
  func.func @transform_6(%arg0: i32, %arg1: i32) -> (i32, i32) {
    %c0_i32 = arith.constant 0 : i32
    %c0_i32_0 = arith.constant 0 : i32
    %c0_i32_1 = arith.constant 0 : i32
    return %c0_i32, %c0_i32_0 : i32, i32
  }
}

</mosaic_0001>

<bundles_post_ra>
// kernel: tpu_custom_call.1
= control target key start
LH: loop header
LB: loop body
LE: loop exit
PB: predicated region body
PF: predicated region fallthrough
CT: control target
= control target key end

     0   :  { %12 = vsyncpa [#allocation3], 0  ;;  %s1339_s0 = inlined_call_operand.hbm [shape: f32[2,4,256], index: 0, kind: input, shape index: {}]   ;;  %s1340_s1 = inlined_call_operand.hbm [shape: f32[2,4,256], index: 1, kind: input, shape index: {}]   ;;  %s1341_s2 = inlined_call_operand.vmem [shape: f32[4,1], index: 2, kind: output, shape index: {0}]   ;;  %s1342_s3 = inlined_call_operand.vmem [shape: f32[4,1], index: 3, kind: output, shape index: {1}]   ;;  %s1343_s4 = inlined_call_operand.hbm [shape: f32[4,4], index: 4, kind: output, shape index: {2}]   ;;  %s1344_s5 = inlined_call_operand.hbm [shape: f32[4,4], index: 5, kind: output, shape index: {3}]   ;;  %s1345_s6 = inlined_call_operand.hbm [shape: f32[4,4], index: 6, kind: output, shape index: {4}]  }
   0x1   :  { %14 = vsyncpa [#allocation3 + $0x1], 0 }
   0x2   :  { %15 = vsyncpa [#allocation6], 0 }
   0x3   :  { %17 = vsyncpa [#allocation6 + $0x1], 0 }
   0x4   :  { %18 = vsyncpa [#allocation4], 0 }
   0x5   :  { %19 = vsyncpa [#allocation9], 0  ;;  %s1066_s21 = smov 0   ;;  %s1068_s22 = smov 0  }
   0x6   :  { %s1070_s23 = smov 0   ;;  %s1072_s24 = smov 0  }
   0x7   :  { %s1074_s25 = smov 0   ;;  %s1076_s26 = smov 0  }
   0x8 LB: > { %s715_s27 = sadd.s32 4294967295, %s1023_s26   ;;  %s37_s28 = sadd.s32 1, %s1019_s25  ;;  %s1023_s26 = sphi %s1076_s26, %s25_s26   ;;  %s1019_s25 = sphi %s1074_s25, %s1360_s25   ;;  %s1015_s24 = sphi %s1072_s24, %s1359_s24   ;;  %s1011_s23 = sphi %s1070_s23, %s1358_s23   ;;  %s1007_s22 = sphi %s1068_s22, %s1357_s22   ;;  %s1003_s21 = sphi %s1066_s21, %s1356_s21  }
   0x9   : > { %p39_p0 = scmp.ge.s32.totalorder %s37_s28, 2  ;;  %s46_s29 = sadd.s32 1, %s1011_s23 }
   0xa   : > { %p53_p1 = scmp.ne.s32.totalorder %s1011_s23, %s1007_s22  ;;  %p54_p2 = scmp.eq.s32.totalorder %s1023_s26, 0 }
   0xb   : > { %s1362_s28 = smov (%p39_p0, %s37_s28), 0  ;;  %p59_p4 = scmp.ne.s32.totalorder %s1007_s22, %s1003_s21 }
   0xc   : > { %p1102_p3 = por %p54_p2, %p53_p1  ;;  %s41_s7 = ssub.s32 %s1019_s25, %s1362_s28 }
   0xd   : > { %p60_p5 = scmp.eq.s32.totalorder %s715_s27, 0  ;;  %p44_p6 = scmp.eq.s32.totalorder %s41_s7, 0 }
   0xe   : > { %p762_p8 = scmp.lt.s32.totalorder %s1023_s26, 2  ;;  %s1120_s10 = sand.u32 1, %s1011_s23  }
   0xf   : > { %p1111_p7 = por %p60_p5, %p59_p4  ;;  %s736_s11 = sshll.u32 %s1019_s25, 7 }
  0x10   : > { %s1117_s9 = scalar_select %p44_p6, %s1011_s23, %s46_s29  }
  0x11   : > { %s1348_s8 = scalar_select %p1111_p7, 1, 0 }
  0x12   : > { %s718_s12 = sshll.u32 %s1120_s10, 3  ;;  %s1129_s15 = scalar_lea.hbm %s1339_s0, %s736_s11 }
  0x13   : > { %s220_s16 = scalar_lea.vmem [#allocation2], %s718_s12  ;;  %p1135_p9 = pnand %p762_p8, %p1102_p3 }
  0x14   : > { %s230_s17 = sshll.u32 %s220_s16, 4  ;;  %s217_s19 = scalar_lea.sflag [#allocation3], %s1120_s10  ;;  %s1139_s17 = int_to_ptr.vmem [resolvable:$true] %s230_s17 }
  0x15   : > { %s823_s20 = scalar_lea.hbm %s1129_s15, 128  ;;  %p825_p13 = pneg %p1135_p9 }
  0x16   : > { %p824_p12 = scmp.ne.s32.totalorder %s1129_s15, %s823_s20  ;;  %s828_s30 = scalar_lea.hbm %s1339_s0, 256 }
  0x17   : > { %p829_p2 = scmp.lt.u32.totalorder %s1129_s15, %s1339_s0  ;;  %p830_p3 = scmp.lt.u32.totalorder %s828_s30, %s823_s20 }
  0x18   : > { %p826_p0 = pnand %p825_p13, %p824_p12  ;;  %p832_p5 = scmp.lt.u32.totalorder %s823_s20, %s1129_s15 }
  0x19   : > { %p831_p4 = por %p830_p3, %p829_p2 }
  0x1a   : > { %p827_p1 = pneg %p826_p0 }
  0x1b   : > { %p833_p6 = por %p832_p5, %p831_p4 }
  0x1d   : > { %p834_p8 = pnand %p833_p6, %p827_p1 }
  0x1f   : > { %837 = shalt.err (!%p834_p8)
}
  0x20   : > { %s838_s14 = scalar_lea.vmem %s1139_s17, 128  ;;  %s1025_s16 = smov [#allocation2]  }
  0x21   : > { %p839_p12 = scmp.ne.s32.totalorder %s1139_s17, %s838_s14  ;;  %s843_s21 = sshll.u32 %s1025_s16, 4  ;;  %s844_s21 = int_to_ptr.vmem [resolvable:$false] %s843_s21 }
  0x22   : > { %s845_s29 = scalar_lea.vmem %s844_s21, 256  ;;  %p846_p11 = scmp.lt.s32.totalorder %s1139_s17, %s844_s21 }
  0x23   : > { %p841_p0 = pnand %p839_p12, %p825_p13  ;;  %p847_p2 = scmp.lt.s32.totalorder %s845_s29, %s838_s14 }
  0x25   : > { %p842_p10 = pneg %p841_p0  ;;  %p848_p3 = por %p847_p2, %p846_p11 }
  0x27   : > { %p849_p4 = pnand %p848_p3, %p842_p10 }
  0x29   : > { %852 = shalt.err (!%p849_p4)
}
  0x2a   : > { %758 = dma.hbm_to_vmem [thread:$0]  (!%p1135_p9), %s1129_s15, 128, %s1139_s17, %s217_s19  }
  0x2b   : > { %p1350_p1 = scmp.lt.s32.totalorder %s1023_s26, 3  ;;  %p1351_p5 = scmp.ge.s32.totalorder %s1023_s26, 1 }
  0x2c   : > { %s1182_s13 = scalar_lea.hbm %s1340_s1, %s736_s11  ;;  %s241_s14 = scalar_lea.vmem [#allocation5], %s718_s12 }
  0x2d   : > { %p1173_p6 = pnand %p1351_p5, %p1350_p1  ;;  %s251_s16 = sshll.u32 %s241_s14, 4  ;;  %s252_s16 = int_to_ptr.vmem [resolvable:$true] %s251_s16 }
  0x2e   : > { %s238_s15 = scalar_lea.sflag [#allocation6], %s1120_s10  ;;  %s853_s17 = scalar_lea.hbm %s1182_s13, 128 }
  0x2f   : > { %s1352_s20 = scalar_select %p1173_p6, 1, 0 }
  0x30   : > { %p854_p10 = scmp.ne.s32.totalorder %s1182_s13, %s853_s17  ;;  %s858_s11 = scalar_lea.hbm %s1340_s1, 256 }
  0x31   : > { %p859_p12 = scmp.lt.u32.totalorder %s1182_s13, %s1340_s1  ;;  %p860_p0 = scmp.lt.u32.totalorder %s858_s11, %s853_s17 }
  0x32   : > { %p856_p11 = pnand %p854_p10, %p825_p13  ;;  %p862_p3 = scmp.lt.u32.totalorder %s853_s17, %s1182_s13 }
  0x33   : > { %p861_p2 = por %p860_p0, %p859_p12 }
  0x34   : > { %p857_p8 = pneg %p856_p11 }
  0x35   : > { %p863_p4 = por %p862_p3, %p861_p2 }
  0x37   : > { %p864_p1 = pnand %p863_p4, %p857_p8 }
  0x39   : > { %867 = shalt.err (!%p864_p1)
}
  0x3a   : > { %s868_s10 = scalar_lea.vmem %s252_s16, 128  ;;  %s1026_s12 = smov [#allocation5]  }
  0x3b   : > { %p869_p5 = scmp.ne.s32.totalorder %s252_s16, %s868_s10  ;;  %s873_s7 = sshll.u32 %s1026_s12, 4  ;;  %s874_s7 = int_to_ptr.vmem [resolvable:$false] %s873_s7 }
  0x3c   : > { %s875_s14 = scalar_lea.vmem %s874_s7, 256  ;;  %p876_p7 = scmp.lt.s32.totalorder %s252_s16, %s874_s7 }
  0x3d   : > { %p871_p10 = pnand %p869_p5, %p825_p13  ;;  %p877_p6 = scmp.lt.s32.totalorder %s875_s14, %s868_s10 }
  0x3f   : > { %p872_p11 = pneg %p871_p10  ;;  %p878_p0 = por %p877_p6, %p876_p7 }
  0x41   : > { %p879_p12 = pnand %p878_p0, %p872_p11 }
  0x43   : > { %882 = shalt.err (!%p879_p12)
}
  0x44   : > { %761 = dma.hbm_to_vmem [thread:$0]  (!%p1135_p9), %s1182_s13, 128, %s252_s16, %s238_s15  }
  0x45   : > { %p1353_p8 = scmp.ne.s32.totalorder %s1352_s20, 0 }
  0x46   : > { %s262_s17 = sand.u32 (!%p1353_p8), 1, %s1007_s22   ;;  %p1354_p13 = scmp.ne.s32.totalorder (!%p1353_p8), %s1348_s8, 0 }
  0x47   : > { %260 = sbr.rel (%p1353_p8) target bundleno = 371 (0x173), region = 28  ;;  %s725_s19 = sshll.u32 (!%p1353_p8), %s262_s17, 3 }
  0x48   : > { %s263_s21 = scalar_lea.sflag (!%p1353_p8), [#allocation3], %s262_s17  ;;  %s266_s11 = scalar_lea.vmem (!%p1353_p8), [#allocation2], %s725_s19 }
  0x4e   : > { %986 = dma.done.wait (%p1354_p13), %s263_s21, 128  }
  0x4f   : > { %988 = vsyncadd (%p1354_p13), %s263_s21, 4294967168  ;;  %s272_s29 = scalar_lea.sflag [#allocation6], %s262_s17  ;;  %s275_s30 = scalar_lea.vmem [#allocation5], %s725_s19 }
  0x50   : > { %990 = dma.done.wait (%p1354_p13), %s272_s29, 128  }
  0x51   : > { %992 = vsyncadd (%p1354_p13), %s272_s29, 4294967168  ;;  %p306_p7 = scmp.eq.s32.totalorder %s1015_s24, 0 }
  0x52   : > { %vm312_vm0 = vcmask (%p306_p7), 3072   ;;  %vm315_vm1 = vcmask (%p306_p7), 27648   ;;  %v1027_v0 = vmov (%p306_p7), 0.0  }
  0x53   : > { %311 = sbr.rel (!%p306_p7) target bundleno = 90 (0x5a), region = 40  ;;  %313 = vst.msk [vmem:[%s1341_s2] sm:$0xf] (%p306_p7), %vm312_vm0, %v1027_v0  ;;  %314 = vst.msk [vmem:[%s1342_s3] sm:$0xf] (%p306_p7), %vm312_vm0, %v1027_v0 }
  0x54   : > { %316 = vst.msk [vmem:[#allocation7] sm:$0xf] (%p306_p7), %vm315_vm1, %v1027_v0  ;;  %317 = vst.msk [vmem:[#allocation8] sm:$0xf] (%p306_p7), %vm315_vm1, %v1027_v0 }
  0x55   : > { %318 = vst.msk [vmem:[#allocation10] sm:$0xf] (%p306_p7), %vm315_vm1, %v1027_v0 }
  0x5a PF: > { %v319_v1 = vld [vmem:[%s266_s11] sm:$0xff]  ;;  %v320_v2 = vld [vmem:[%s275_s30] sm:$0xff]  ;;  %vm325_vm2 = vcmask 1043456   ;;  %vm332_vm3 = vcmask 3072   ;;  %s1028_s19 = smov [#allocation7]   ;;  %s1029_s11 = smov [#allocation8]  }
  0x5b   : > { %v323_v3 = vcombine.high %v319_v1, %v319_v1  ;;  %v336_v4 = vcombine.high %v320_v2, %v320_v2  ;;  %v326_v5 = vsel %vm325_vm2, %v319_v1, 0.0  ;;  %v338_v7 = vsel %vm325_vm2, %v320_v2, 0.0  ;;  %v321_v11 = vld [vmem:[%s1341_s2] sm:$0xf]  ;;  %s578_s21 = sshll.u32 %s1028_s19, 4  ;;  %s589_s29 = sshll.u32 %s1029_s11, 4  ;;  %s579_s21 = int_to_ptr.vmem [resolvable:$true] %s578_s21  ;;  %s1242_s29 = int_to_ptr.vmem [resolvable:$true] %s589_s29 }
  0x5c   : > { %v334_v14 = vld [vmem:[%s1342_s3] sm:$0xf]  ;;  %v419_v18 = vld [vmem:[#allocation8] sm:$0xf]  ;;  %vm417_vm4 = vcmask 27648   ;;  %p1238_p9 = scmp.eq.s32.totalorder %s715_s27, 1  ;;  %p890_p4 = scmp.lt.s32.totalorder %s579_s21, %s579_s21 }
  0x5d   : > { %346 = vmatprep.subr.mxu0 %v323_v3  ;;  %410 = vmatprep.mubr.f32.mxu0 %v323_v3  ;;  %v327_v6 = vsel %vm325_vm2, %v323_v3, 0.0  ;;  %v339_v8 = vsel %vm325_vm2, %v336_v4, 0.0  ;;  %v345_v17 = vld [vmem:[#allocation7] sm:$0xf]  ;;  %s1030_s18 = smov [#allocation10]   ;;  %s883_s27 = scalar_lea.vmem %s579_s21, 64 }
  0x5e   : > { %347 = vmatpush1.xpose.msra.mxu0 %v319_v1  ;;  %420 = vmatprep.subr.mxu1 %v336_v4  ;;  %v328_v9 = vadd.f32 %v327_v6, %v326_v5  ;;  %v340_v10 = vadd.f32 %v339_v8, %v338_v7  ;;  %s600_s20 = sshll.u32 %s1030_s18, 4  ;;  %v492_v25 = vld [vmem:[#allocation10] sm:$0xf]  ;;  %p884_p6 = scmp.ne.s32.totalorder %s579_s21, %s883_s27  ;;  %s1245_s20 = int_to_ptr.vmem [resolvable:$true] %s600_s20 }
  0x5f   : > { %421 = vmatpush1.xpose.msra.mxu1 %v320_v2  ;;  %493 = vmatprep.subr.mxu0 %v336_v4  ;;  %p891_p1 = scmp.lt.s32.totalorder %s883_s27, %s883_s27 }
  0x60   : > { %484 = vmatprep.mubr.f32.mxu1 %v323_v3  ;;  %329 = vadd.xlane.f32.xlu0 %v328_v9  ;;  %p885_p2 = pnand %p884_p6, %p1238_p9 }
  0x61   : > { %411 = vmatmul.mubr.f32.vlgmr.msra.gmra.mrb[0].mxu0 %v319_v1  ;;  %p892_p5 = por %p891_p1, %p890_p4 }
  0x62   : > { %494 = vmatpush1.xpose.msra.mxu0 %v320_v2  ;;  %485 = vmatmul.mubr.f32.vlgmr.msra.gmra.mrb[0].mxu1 %v319_v1  ;;  %p886_p3 = pneg %p885_p2 }
  0x63   : > { %557 = vmatprep.mubr.f32.mxu0 %v336_v4 }
  0x64   : > { %341 = vadd.xlane.f32.xlu0 %v340_v10  ;;  %p893_p10 = pnand %p892_p5, %p886_p3 }
  0x65   : > { %558 = vmatmul.mubr.f32.vlgmr.msra.gmra.mrb[2].mxu0 %v320_v2 }
  0xed   : > { %v330_v12 = vpop.xlane.xlu0 %329 }
  0xee   : > { %v331_v13 = vadd.f32 %v330_v12, %v321_v11 }
  0xf0   : > { %333 = vst.msk [vmem:[%s1341_s2] sm:$0xf] %vm332_vm3, %v331_v13 }
  0xf1   : > { %v342_v15 = vpop.xlane.xlu0 %341 }
  0xf2   : > { %v343_v16 = vadd.f32 %v342_v15, %v334_v14 }
  0xf4   : > { %344 = vst.msk [vmem:[%s1342_s3] sm:$0xf] %vm332_vm3, %v343_v16 }
 0x134   : > { %v412_v19 = vpop.f32.mrb[0].mxu0 }
 0x135   : > { %v416_v20 = vadd.f32 %v412_v19, %v345_v17  ;;  %v414_v21 = vpop.f32.mrb[1].mxu0  ;;  %v486_v22 = vpop.f32.mrb[0].mxu1 }
 0x136   : > { %v490_v23 = vadd.f32 %v486_v22, %v419_v18  ;;  %v488_v24 = vpop.f32.mrb[1].mxu1 }
 0x137   : > { %418 = vst.msk [vmem:[#allocation7] sm:$0xf] %vm417_vm4, %v416_v20 }
 0x138   : > { %v559_v26 = vpop.f32.mrb[2].mxu0  ;;  %491 = vst.msk [vmem:[#allocation8] sm:$0xf] %vm417_vm4, %v490_v23 }
 0x139   : > { %896 = shalt.err (!%p893_p10)
}
 0x13a   : > { %s897_s24 = scalar_lea.hbm %s1343_s4, 64 }
 0x13b   : > { %p898_p11 = scmp.ne.s32.totalorder %s1343_s4, %s897_s24  ;;  %p903_p8 = scmp.lt.u32.totalorder %s897_s24, %s1343_s4 }
 0x13d   : > { %p899_p0 = pnand %p898_p11, %p1238_p9 }
 0x13f   : > { %p900_p12 = pneg %p899_p0 }
 0x141   : > { %p905_p13 = pnand %p903_p8, %p900_p12 }
 0x143   : > { %908 = shalt.err (!%p905_p13)
}
 0x144   : > { %744 = dma.vmem_to_hbm [thread:$0]  (%p1238_p9), %s579_s21, 64, %s1343_s4, [#allocation4]   ;;  %v563_v27 = vadd.f32 %v559_v26, %v492_v25  ;;  %v561_v28 = vpop.f32.mrb[3].mxu0 }
 0x145   : > { %s909_s17 = scalar_lea.vmem %s1242_s29, 64  ;;  %p916_p3 = scmp.lt.s32.totalorder %s1242_s29, %s1242_s29 }
 0x146   : > { %p910_p7 = scmp.ne.s32.totalorder %s1242_s29, %s909_s17  ;;  %p917_p4 = scmp.lt.s32.totalorder %s909_s17, %s909_s17 }
 0x148   : > { %p911_p6 = pnand %p910_p7, %p1238_p9  ;;  %p918_p1 = por %p917_p4, %p916_p3 }
 0x14a   : > { %p912_p2 = pneg %p911_p6 }
 0x14c   : > { %p919_p5 = pnand %p918_p1, %p912_p2 }
 0x14e   : > { %922 = shalt.err (!%p919_p5)
}
 0x14f   : > { %s923_s18 = scalar_lea.hbm %s1344_s5, 64 }
 0x150   : > { %p924_p10 = scmp.ne.s32.totalorder %s1344_s5, %s923_s18  ;;  %p929_p12 = scmp.lt.u32.totalorder %s923_s18, %s1344_s5 }
 0x152   : > { %p925_p11 = pnand %p924_p10, %p1238_p9 }
 0x154   : > { %p926_p0 = pneg %p925_p11 }
 0x156   : > { %p931_p8 = pnand %p929_p12, %p926_p0 }
 0x158   : > { %934 = shalt.err (!%p931_p8)
}
 0x159   : > { %746 = dma.vmem_to_hbm [thread:$0]  (%p1238_p9), %s1242_s29, 64, %s1344_s5, [#allocation9]   ;;  %564 = vst.msk [vmem:[#allocation10] sm:$0xf] %vm417_vm4, %v563_v27 }
 0x15a   : > { %s935_s15 = scalar_lea.vmem %s1245_s20, 64  ;;  %p942_p2 = scmp.lt.s32.totalorder %s1245_s20, %s1245_s20 }
 0x15b   : > { %p936_p13 = scmp.ne.s32.totalorder %s1245_s20, %s935_s15  ;;  %p943_p3 = scmp.lt.s32.totalorder %s935_s15, %s935_s15 }
 0x15d   : > { %p937_p7 = pnand %p936_p13, %p1238_p9  ;;  %p944_p4 = por %p943_p3, %p942_p2 }
 0x15f   : > { %p938_p6 = pneg %p937_p7 }
 0x161   : > { %p945_p1 = pnand %p944_p4, %p938_p6 }
 0x163   : > { %948 = shalt.err (!%p945_p1)
}
 0x164   : > { %s949_s7 = scalar_lea.hbm %s1345_s6, 64 }
 0x165   : > { %p950_p5 = scmp.ne.s32.totalorder %s1345_s6, %s949_s7  ;;  %p955_p0 = scmp.lt.u32.totalorder %s949_s7, %s1345_s6 }
 0x167   : > { %p951_p10 = pnand %p950_p5, %p1238_p9 }
 0x169   : > { %p952_p11 = pneg %p951_p10 }
 0x16b   : > { %p957_p12 = pnand %p955_p0, %p952_p11 }
 0x16d   : > { %960 = shalt.err (!%p957_p12)
}
 0x16e   : > { %748 = dma.vmem_to_hbm [thread:$0]  (%p1238_p9), %s1245_s20, 64, %s1345_s6, [#allocation9]  }
 0x16f   : > { %994 = dma.done.wait (%p1238_p9), [#allocation4], 64  }
 0x170   : > { %996 = vsyncadd (%p1238_p9), [#allocation4], 4294967232 }
 0x171   : > { %998 = dma.done.wait (%p1238_p9), [#allocation9], 128  }
 0x172   : > { %1000 = vsyncadd (%p1238_p9), [#allocation9], 4294967168 }
 0x173 PF: > { %s25_s26 = sadd.s32 1, %s1023_s26   ;;  %s1356_s21 = smov %s1007_s22 }
 0x174   : > { %p22_p8 = scmp.ge.s32.totalorder %s25_s26, 4   ;;  %s1357_s22 = smov %s1011_s23 }
 0x175   : > { %s1358_s23 = smov %s1117_s9  ;;  %s1359_s24 = smov %s1019_s25 }
 0x176   : > { %s1360_s25 = smov %s1362_s28  ;;  %24 = sbr.rel (!%p22_p8) target bundleno = 8 (0x8), region = 114 }
 0x17d   :  { %627 = vsyncpa [#allocation3], 1 }
 0x17e   :  { %629 = vsyncpa [#allocation3 + $0x1], 1 }
 0x17f   :  { %630 = vsyncpa [#allocation6], 1 }
 0x180   :  { %632 = vsyncpa [#allocation6 + $0x1], 1 }
 0x181   :  { %633 = vsyncpa [#allocation4], 1 }
 0x182   :  { %635 = vsyncpa [#allocation4 + $0x1], 1 }
 0x183   :  { %636 = vsyncpa [#allocation9], 1 }

</bundles_post_ra>
